<compile_context>
chip_gen: v6e
topology: v6e:2x2x1
jax: 0.10.0
libtpu: 0.0.40
codegen_flags: <defaults>
</compile_context>

<pallas_src>
import functools

import jax
import jax.numpy as jnp
from jax.experimental import pallas as pl
from jax.experimental.pallas import tpu as pltpu

# bf16 operands for the MXU (f32 accumulation) on real TPUs; plain f32 on the CPU /
# interpret fallback whose dot runtime has no BF16 x BF16 = F32 kernel.
_MXU_DTYPE = jnp.bfloat16 if jax.default_backend() == "tpu" else jnp.float32


# ----------------------------------------------------------------------------- #
# Fused kernel: encode head -> vector quantizer -> decode head -> loss partials
# ----------------------------------------------------------------------------- #
def _fused_vqgan_kernel(x_ref, w1_ref, b1_ref, w2_ref, b2_ref,
                        cb_ref, cbT_ref, cbsq_ref,
                        w3_ref, b3_ref, w4_ref, b4_ref,
                        rec_ref, idx_ref, vq_part_ref, l1_part_ref,
                        *, hw_valid):
    i = pl.program_id(1)                      # pixel-tile index within this image
    tile = x_ref.shape[-1]
    n_e = cb_ref.shape[0]
    mxu = w1_ref.dtype                        # bf16 on TPU, f32 on the fallback path

    x = x_ref[...]                                                     # (c_in, tile) f32

    # ---- encode(): encoder projection (stand-in) + ReLU + 1x1 quant_conv ----
    h = jnp.dot(w1_ref[...], x.astype(mxu),
                preferred_element_type=jnp.float32) + b1_ref[...]      # (hid, tile)
    h = jnp.maximum(h, 0.0)
    z = jnp.dot(w2_ref[...], h.astype(mxu),
                preferred_element_type=jnp.float32) + b2_ref[...]      # (e_dim, tile)

    # ---- VectorQuantizer ----
    # argmin_k ||e_k - z||^2 == argmin_k (||e_k||^2 - 2 e_k.z): the +||z||^2 term is a
    # per-column constant and is dropped (review item).
    d = cbsq_ref[...] - 2.0 * jnp.dot(cb_ref[...], z.astype(mxu),
                                      preferred_element_type=jnp.float32)  # (n_e, tile)

    # first-index argmin over the codebook axis (sublanes), int32 iota (review item)
    d_min = jnp.min(d, axis=0, keepdims=True)                          # (1, tile)
    iota = jax.lax.broadcasted_iota(jnp.int32, (n_e, tile), 0)
    idx = jnp.min(jnp.where(d == d_min, iota, n_e),
                  axis=0, keepdims=True)                               # (1, tile) int32
    idx_ref[...] = idx

    # codebook gather via one-hot matmul in the MXU dtype (no f32 x f32 gather dot)
    onehot = (iota == idx).astype(mxu)                                 # (n_e, tile)
    zq = jnp.dot(cbT_ref[...], onehot,
                 preferred_element_type=jnp.float32)                   # (e_dim, tile)

    # ---- decode(): 1x1 post_quant_conv + ReLU + decoder projection (stand-in) ----
    hq = jnp.dot(w3_ref[...], zq.astype(mxu),
                 preferred_element_type=jnp.float32) + b3_ref[...]     # (zc, tile)
    hq = jnp.maximum(hq, 0.0)
    rec = jnp.dot(w4_ref[...], hq.astype(mxu),
                  preferred_element_type=jnp.float32) + b4_ref[...]    # (c_out, tile)
    rec_ref[...] = rec.astype(rec_ref.dtype)

    # ---- per-tile loss partials (lane-dense; reduced once in the wrapper) ----
    col = i * tile + jax.lax.broadcasted_iota(jnp.int32, (1, tile), 1)
    valid = (col < hw_valid).astype(jnp.float32)                       # mask padded pixels
    vq_part_ref[...] = jnp.sum((zq - z) ** 2, axis=0, keepdims=True) * valid
    l1_part_ref[...] = jnp.sum(jnp.abs(x - rec), axis=0, keepdims=True) * valid


# ----------------------------------------------------------------------------- #
# Helpers
# ----------------------------------------------------------------------------- #
def _round_up(x, m):
    return ((x + m - 1) // m) * m


def _resident_spec(shape):
    """BlockSpec for constant-index-map inputs; request single buffering so resident
    weights / codebook copies are not double-buffered (review item)."""
    index_map = lambda b, i, _n=len(shape): (0,) * _n
    if hasattr(pl, "Buffered"):
        try:
            return pl.BlockSpec(shape, index_map, pipeline_mode=pl.Buffered(buffer_count=1))
        except TypeError:
            pass
    return pl.BlockSpec(shape, index_map)


def _pick_tile(hw, n_e, batch, vmem_budget_bytes, max_tile=2048):
    """Lane-tile as a function of n_e and the VMEM budget (review item):
    ~3 live (n_e, tile) f32 temporaries dominate per-tile VMEM; keep them within ~half
    the budget.  Always a multiple of 128; keep the parallel grid >= 2 steps (v7x)."""
    per_col_bytes = max(1, 3 * n_e * 4)
    tile = (vmem_budget_bytes // 2) // per_col_bytes
    tile = max(128, min(int(tile), max_tile))
    tile = min(tile, _round_up(hw, 128))
    tile = max(128, (tile // 128) * 128)
    if batch * pl.cdiv(hw, tile) < 2 and tile > 128:
        tile = max(128, ((_round_up(hw, 128) // 2) // 128) * 128)
    return tile


# ----------------------------------------------------------------------------- #
# Fused forward over a (B, C, H*W) slab
# ----------------------------------------------------------------------------- #
def fused_vqgan_forward(x_bcn, params, *, vmem_budget_bytes=32 * 1024 * 1024):
    """x_bcn: (B, C, HW).  Returns (rec (B, C, HW), idx (B, HW), sq_sum, l1_sum)."""
    bsz, c_in, hw = x_bcn.shape
    hid = params["enc_w"].shape[1]
    n_e, e_dim = params["codebook"].shape
    zc = params["post_quant_conv_w"].shape[1]
    c_out = params["dec_w"].shape[1]

    tile = _pick_tile(hw, n_e, bsz, vmem_budget_bytes)
    num_ptiles = pl.cdiv(hw, tile)
    hw_pad = num_ptiles * tile
    if hw_pad != hw:
        x_bcn = jnp.pad(x_bcn, ((0, 0), (0, 0), (0, hw_pad - hw)))

    mxu = _MXU_DTYPE
    # Weights / codebook copies in the MXU dtype; biases and ||e||^2 stay f32.
    w1 = params["enc_w"].T.astype(mxu)                        # (hid, c_in)
    b1 = params["enc_b"].T                                    # (hid, 1)
    w2 = params["quant_conv_w"].T.astype(mxu)                 # (e_dim, hid)
    b2 = params["quant_conv_b"].T                             # (e_dim, 1)
    cb = params["codebook"]                                   # (n_e, e_dim) f32
    cb_m = cb.astype(mxu)                                     # distance matmul operand
    cbT_m = cb.T.astype(mxu)                                  # (e_dim, n_e) gather operand
    cbsq = jnp.sum(cb * cb, axis=1, keepdims=True)            # (n_e, 1) f32
    w3 = params["post_quant_conv_w"].T.astype(mxu)            # (zc, e_dim)
    b3 = params["post_quant_conv_b"].T                        # (zc, 1)
    w4 = params["dec_w"].T.astype(mxu)                        # (c_out, zc)
    b4 = params["dec_b"].T                                    # (c_out, 1)

    act = lambda b, i: (b, 0, i)        # (B, C, HW) activation slabs
    part = lambda b, i: (b, i, 0, 0)    # (B, num_ptiles, 1, tile) lane-dense partials

    rec, idx, vq_part, l1_part = pl.pallas_call(
        functools.partial(_fused_vqgan_kernel, hw_valid=hw),
        out_shape=(
            jax.ShapeDtypeStruct((bsz, c_out, hw_pad), jnp.float32),
            jax.ShapeDtypeStruct((bsz, num_ptiles, 1, tile), jnp.int32),
            jax.ShapeDtypeStruct((bsz, num_ptiles, 1, tile), jnp.float32),
            jax.ShapeDtypeStruct((bsz, num_ptiles, 1, tile), jnp.float32),
        ),
        grid=(bsz, num_ptiles),
        in_specs=[
            pl.BlockSpec((None, c_in, tile), act),   # x: channels on sublanes, pixels on lanes
            _resident_spec((hid, c_in)),             # w1
            _resident_spec((hid, 1)),                # b1
            _resident_spec((e_dim, hid)),            # w2 (quant_conv)
            _resident_spec((e_dim, 1)),              # b2
            _resident_spec((n_e, e_dim)),            # codebook (MXU dtype, distances)
            _resident_spec((e_dim, n_e)),            # codebook^T (MXU dtype, gather)
            _resident_spec((n_e, 1)),                # ||e||^2
            _resident_spec((zc, e_dim)),             # w3 (post_quant_conv)
            _resident_spec((zc, 1)),                 # b3
            _resident_spec((c_out, zc)),             # w4
            _resident_spec((c_out, 1)),              # b4
        ],
        out_specs=(
            pl.BlockSpec((None, c_out, tile), act),        # recons (lane-dense)
            pl.BlockSpec((None, None, 1, tile), part),     # code indices
            pl.BlockSpec((None, None, 1, tile), part),     # per-tile (zq - z)^2 partials
            pl.BlockSpec((None, None, 1, tile), part),     # per-tile |x - rec| partials
        ),
        compiler_params=pltpu.CompilerParams(
            # No cross-step state -> fully parallel grid (safe for v7x 2-TC sharding).
            dimension_semantics=("parallel", "parallel"),
            # 32 MiB is safe on every generation incl. v7x (64 MiB physical); raise on
            # v5e/v6e (128 MiB) for large resident codebooks instead of chunking.
            vmem_limit_bytes=vmem_budget_bytes,
        ),
    )(x_bcn, w1, b1, w2, b2, cb_m, cbT_m, cbsq, w3, b3, w4, b4)

    rec = rec[:, :, :hw]
    idx = idx.reshape(bsz, num_ptiles * tile)[:, :hw]
    return rec, idx, jnp.sum(vq_part), jnp.sum(l1_part)


# ----------------------------------------------------------------------------- #
# Model wrapper (glue: free views, parameter bookkeeping, scalar math)
# ----------------------------------------------------------------------------- #
def init_params(key, *, c_in, z_channels, embed_dim, n_embed):
    ks = jax.random.split(key, 9)
    s = 0.1
    hid = 2 * z_channels  # EncoderCond output: z_channels * 2 (fed to quant_conv)
    return dict(
        enc_w=jax.random.normal(ks[0], (c_in, hid), jnp.float32) * s,
        enc_b=jax.random.normal(ks[1], (1, hid), jnp.float32) * s,
        quant_conv_w=jax.random.normal(ks[2], (hid, embed_dim), jnp.float32) * s,
        quant_conv_b=jax.random.normal(ks[3], (1, embed_dim), jnp.float32) * s,
        codebook=jax.random.uniform(ks[4], (n_embed, embed_dim), jnp.float32,
                                    -1.0 / n_embed, 1.0 / n_embed),
        post_quant_conv_w=jax.random.normal(ks[5], (embed_dim, z_channels),
                                            jnp.float32) * s,
        post_quant_conv_b=jax.random.normal(ks[6], (1, z_channels), jnp.float32) * s,
        dec_w=jax.random.normal(ks[7], (z_channels, c_in), jnp.float32) * s,
        dec_b=jax.random.normal(ks[8], (1, c_in), jnp.float32) * s,
    )


@functools.partial(jax.jit, static_argnames=("optimizer_idx", "global_step"))
def vq_model_cond_forward(x_nchw, params, optimizer_idx=0, global_step=0):
    """Returns (recons [NCHW], loss scalar, log_dict) mirroring VQModelCond.forward."""
    beta = 0.25
    codebook_weight = 1.0
    b, c, h, w = x_nchw.shape
    hw = h * w
    n = b * hw
    e_dim = params["codebook"].shape[1]

    # NCHW -> (B, C, H*W): a free view -- no transpose, no extra HBM round-trip.
    x_flat = x_nchw.reshape(b, c, hw)

    rec_flat, idx, sq_sum, l1_total = fused_vqgan_forward(x_flat, params)

    # quantize(): forward value of the VectorQuantizer loss == (1 + beta) * mse(zq, z)
    emb_loss = (1.0 + beta) * sq_sum / jnp.float32(n * e_dim)
    # compute_loss(): simplified VQLoss generator branch (L1 rec + codebook term)
    rec_loss = l1_total / jnp.float32(n * c)
    loss = rec_loss + codebook_weight * emb_loss

    recons = rec_flat.reshape(b, c, h, w)   # free view back to NCHW

    log_dict = {
        "train/total_loss": loss,
        "train/quant_loss": emb_loss,
        "train/rec_loss": rec_loss,
        "indices": idx,                     # (B, H*W)
    }
    return recons, loss, log_dict


# ----------------------------------------------------------------------------- #
# Pure-JAX reference (same dtype casts as the kernel) for a correctness cross-check
# ----------------------------------------------------------------------------- #
def _reference_forward(x_nchw, params, mxu_dtype):
    beta = 0.25
    b, c, h, w = x_nchw.shape
    n = b * h * w
    f32 = jnp.float32
    x = jnp.transpose(x_nchw, (0, 2, 3, 1)).reshape(n, c)
    hdn = jnp.maximum(jnp.dot(x.astype(mxu_dtype), params["enc_w"].astype(mxu_dtype),
                              preferred_element_type=f32) + params["enc_b"], 0.0)
    z = jnp.dot(hdn.astype(mxu_dtype), params["quant_conv_w"].astype(mxu_dtype),
                preferred_element_type=f32) + params["quant_conv_b"]
    cb = params["codebook"]
    d = (jnp.sum(cb * cb, axis=1)[None, :]
         - 2.0 * jnp.dot(z.astype(mxu_dtype), cb.T.astype(mxu_dtype),
                         preferred_element_type=f32))
    idx = jnp.argmin(d, axis=1)
    zq = cb.astype(mxu_dtype).astype(f32)[idx]     # matches the in-kernel one-hot gather
    emb_loss = (1.0 + beta) * jnp.mean((zq - z) ** 2)
    hq = jnp.maximum(jnp.dot(zq.astype(mxu_dtype), params["post_quant_conv_w"].astype(mxu_dtype),
                             preferred_element_type=f32) + params["post_quant_conv_b"], 0.0)
    rec = jnp.dot(hq.astype(mxu_dtype), params["dec_w"].astype(mxu_dtype),
                  preferred_element_type=f32) + params["dec_b"]
    rec_loss = jnp.mean(jnp.abs(x - rec))
    loss = rec_loss + emb_loss
    recons = jnp.transpose(rec.reshape(b, h, w, c), (0, 3, 1, 2))
    return recons, loss, idx.reshape(b, h * w).astype(jnp.int32)


if __name__ == "__main__":
    B, C, H, W = 2, 3, 16, 16
    Z_CHANNELS, EMBED_DIM, N_EMBED = 8, 8, 32

    key = jax.random.PRNGKey(0)
    k_x, k_p = jax.random.split(key)
    x = jax.random.normal(k_x, (B, C, H, W), jnp.float32)
    params = init_params(k_p, c_in=C, z_channels=Z_CHANNELS,
                         embed_dim=EMBED_DIM, n_embed=N_EMBED)

    recons, loss, log_dict = vq_model_cond_forward(x, params,
                                                   optimizer_idx=0, global_step=0)
    jax.block_until_ready((recons, loss, log_dict["indices"]))

    assert recons.shape == (B, C, H, W)
    assert recons.dtype == jnp.float32
    assert log_dict["indices"].shape == (B, H * W)
    assert bool(jnp.isfinite(loss))

    # correctness cross-check against a pure-JAX reference with the same dtype casts
    ref_recons, ref_loss, ref_idx = _reference_forward(x, params, _MXU_DTYPE)
    assert bool(jnp.allclose(recons, ref_recons, atol=5e-2, rtol=5e-2))
    assert bool(jnp.abs(loss - ref_loss) < 1e-2)
    assert bool(jnp.mean((log_dict["indices"] == ref_idx).astype(jnp.float32)) >= 0.98)

    print("KERNEL_OK")
</pallas_src>

<mosaic_0001>
module attributes {stable_mosaic.version = 11 : i64} {
  func.func @_fused_vqgan_kernel(%arg0: i32, %arg1: i32, %arg2: memref<1x3x256xf32, #tpu.memory_space<vmem>>, %arg3: memref<16x3xf32, #tpu.memory_space<vmem>>, %arg4: memref<16x1xf32, #tpu.memory_space<vmem>>, %arg5: memref<8x16xf32, #tpu.memory_space<vmem>>, %arg6: memref<8x1xf32, #tpu.memory_space<vmem>>, %arg7: memref<32x8xf32, #tpu.memory_space<vmem>>, %arg8: memref<8x32xf32, #tpu.memory_space<vmem>>, %arg9: memref<32x1xf32, #tpu.memory_space<vmem>>, %arg10: memref<8x8xf32, #tpu.memory_space<vmem>>, %arg11: memref<8x1xf32, #tpu.memory_space<vmem>>, %arg12: memref<3x8xf32, #tpu.memory_space<vmem>>, %arg13: memref<3x1xf32, #tpu.memory_space<vmem>>, %arg14: memref<1x3x256xf32, #tpu.memory_space<vmem>>, %arg15: memref<1x1x1x256xi32, #tpu.memory_space<vmem>>, %arg16: memref<1x1x1x256xf32, #tpu.memory_space<vmem>>, %arg17: memref<1x1x1x256xf32, #tpu.memory_space<vmem>>) attributes {dimension_semantics = [#tpu.dimension_semantics<parallel>, #tpu.dimension_semantics<parallel>], iteration_bounds = array<i64: 2, 1>, scalar_prefetch = 0 : i64, scratch_operands = 0 : i64, tpu.core_type = #tpu.core_type<tc>, window_params = [{transform_indices = @transform_0, window_bounds = array<i64: 1, 3, 256>}, {pipeline_mode = #tpu.pipeline_mode<synchronous>, transform_indices = @transform_1, window_bounds = array<i64: 16, 3>}, {pipeline_mode = #tpu.pipeline_mode<synchronous>, transform_indices = @transform_2, window_bounds = array<i64: 16, 1>}, {pipeline_mode = #tpu.pipeline_mode<synchronous>, transform_indices = @transform_3, window_bounds = array<i64: 8, 16>}, {pipeline_mode = #tpu.pipeline_mode<synchronous>, transform_indices = @transform_4, window_bounds = array<i64: 8, 1>}, {pipeline_mode = #tpu.pipeline_mode<synchronous>, transform_indices = @transform_5, window_bounds = array<i64: 32, 8>}, {pipeline_mode = #tpu.pipeline_mode<synchronous>, transform_indices = @transform_6, window_bounds = array<i64: 8, 32>}, {pipeline_mode = #tpu.pipeline_mode<synchronous>, transform_indices = @transform_7, window_bounds = array<i64: 32, 1>}, {pipeline_mode = #tpu.pipeline_mode<synchronous>, transform_indices = @transform_8, window_bounds = array<i64: 8, 8>}, {pipeline_mode = #tpu.pipeline_mode<synchronous>, transform_indices = @transform_9, window_bounds = array<i64: 8, 1>}, {pipeline_mode = #tpu.pipeline_mode<synchronous>, transform_indices = @transform_10, window_bounds = array<i64: 3, 8>}, {pipeline_mode = #tpu.pipeline_mode<synchronous>, transform_indices = @transform_11, window_bounds = array<i64: 3, 1>}, {transform_indices = @transform_12, window_bounds = array<i64: 1, 3, 256>}, {transform_indices = @transform_13, window_bounds = array<i64: 1, 1, 1, 256>}, {transform_indices = @transform_14, window_bounds = array<i64: 1, 1, 1, 256>}, {transform_indices = @transform_15, window_bounds = array<i64: 1, 1, 1, 256>}]} {
    %c0 = arith.constant 0 : index
    %c0_0 = arith.constant 0 : index
    %c0_1 = arith.constant 0 : index
    %0 = vector.load %arg2[%c0, %c0_0, %c0_1] : memref<1x3x256xf32, #tpu.memory_space<vmem>>, vector<1x3x256xf32>
    %1 = vector.shape_cast %0 : vector<1x3x256xf32> to vector<3x256xf32>
    %c0_2 = arith.constant 0 : index
    %c0_3 = arith.constant 0 : index
    %2 = vector.load %arg3[%c0_2, %c0_3] : memref<16x3xf32, #tpu.memory_space<vmem>>, vector<16x3xf32>
    %cst = arith.constant dense<0.000000e+00> : vector<16x256xf32>
    %3 = tpu.matmul %2, %1, %cst {dimension_numbers = #tpu.dot_dimension_numbers<[1], [0], [0], [1], [0, 0, 1, 1], [], []>} : vector<16x3xf32>, vector<3x256xf32>, vector<16x256xf32> -> vector<16x256xf32>
    %c0_4 = arith.constant 0 : index
    %c0_5 = arith.constant 0 : index
    %4 = vector.load %arg4[%c0_4, %c0_5] : memref<16x1xf32, #tpu.memory_space<vmem>>, vector<16x1xf32>
    %5 = vector.broadcast %4 : vector<16x1xf32> to vector<16x256xf32>
    %6 = arith.addf %3, %5 : vector<16x256xf32>
    %cst_6 = arith.constant 0.000000e+00 : f32
    %7 = vector.broadcast %cst_6 : f32 to vector<16x256xf32>
    %8 = arith.maximumf %6, %7 : vector<16x256xf32>
    %c0_7 = arith.constant 0 : index
    %c0_8 = arith.constant 0 : index
    %9 = vector.load %arg5[%c0_7, %c0_8] : memref<8x16xf32, #tpu.memory_space<vmem>>, vector<8x16xf32>
    %cst_9 = arith.constant dense<0.000000e+00> : vector<8x256xf32>
    %10 = tpu.matmul %9, %8, %cst_9 {dimension_numbers = #tpu.dot_dimension_numbers<[1], [0], [0], [1], [0, 0, 1, 1], [], []>} : vector<8x16xf32>, vector<16x256xf32>, vector<8x256xf32> -> vector<8x256xf32>
    %c0_10 = arith.constant 0 : index
    %c0_11 = arith.constant 0 : index
    %11 = vector.load %arg6[%c0_10, %c0_11] : memref<8x1xf32, #tpu.memory_space<vmem>>, vector<8x1xf32>
    %12 = vector.broadcast %11 : vector<8x1xf32> to vector<8x256xf32>
    %13 = arith.addf %10, %12 : vector<8x256xf32>
    %c0_12 = arith.constant 0 : index
    %c0_13 = arith.constant 0 : index
    %14 = vector.load %arg9[%c0_12, %c0_13] : memref<32x1xf32, #tpu.memory_space<vmem>>, vector<32x1xf32>
    %c0_14 = arith.constant 0 : index
    %c0_15 = arith.constant 0 : index
    %15 = vector.load %arg7[%c0_14, %c0_15] : memref<32x8xf32, #tpu.memory_space<vmem>>, vector<32x8xf32>
    %cst_16 = arith.constant dense<0.000000e+00> : vector<32x256xf32>
    %16 = tpu.matmul %15, %13, %cst_16 {dimension_numbers = #tpu.dot_dimension_numbers<[1], [0], [0], [1], [0, 0, 1, 1], [], []>} : vector<32x8xf32>, vector<8x256xf32>, vector<32x256xf32> -> vector<32x256xf32>
    %cst_17 = arith.constant 2.000000e+00 : f32
    %17 = vector.broadcast %cst_17 : f32 to vector<32x256xf32>
    %18 = arith.mulf %17, %16 : vector<32x256xf32>
    %19 = vector.broadcast %14 : vector<32x1xf32> to vector<32x256xf32>
    %20 = arith.subf %19, %18 : vector<32x256xf32>
    %cst_18 = arith.constant dense<0x7F800000> : vector<256xf32>
    %21 = vector.multi_reduction <minimumf>, %20, %cst_18 [0] : vector<32x256xf32> to vector<256xf32>
    %22 = vector.shape_cast %21 : vector<256xf32> to vector<1x256xf32>
    %23 = tpu.iota {dimensions = array<i32: 0>} : vector<32x256xi32>
    %24 = vector.broadcast %22 : vector<1x256xf32> to vector<32x256xf32>
    %25 = arith.cmpf oeq, %20, %24 : vector<32x256xf32>
    %c32_i32 = arith.constant 32 : i32
    %26 = vector.broadcast %c32_i32 : i32 to vector<32x256xi32>
    %27 = arith.select %25, %23, %26 : vector<32x256xi1>, vector<32x256xi32>
    %cst_19 = arith.constant dense<2147483647> : vector<256xi32>
    %28 = vector.multi_reduction <minsi>, %27, %cst_19 [0] : vector<32x256xi32> to vector<256xi32>
    %29 = vector.shape_cast %28 : vector<256xi32> to vector<1x256xi32>
    %c0_20 = arith.constant 0 : index
    %c0_21 = arith.constant 0 : index
    %c0_22 = arith.constant 0 : index
    %c0_23 = arith.constant 0 : index
    %30 = vector.load %arg15[%c0_20, %c0_21, %c0_22, %c0_23] : memref<1x1x1x256xi32, #tpu.memory_space<vmem>>, vector<1x1x1x256xi32>
    %31 = vector.shape_cast %30 : vector<1x1x1x256xi32> to vector<1x256xi32>
    %32 = vector.shape_cast %29 : vector<1x256xi32> to vector<1x1x1x256xi32>
    tpu.vector_store %arg15[%c0_20, %c0_21, %c0_22, %c0_23], %32 {strides = array<i32>} : memref<1x1x1x256xi32, #tpu.memory_space<vmem>>, vector<1x1x1x256xi32>,
    %33 = vector.broadcast %29 : vector<1x256xi32> to vector<32x256xi32>
    %34 = arith.cmpi eq, %23, %33 : vector<32x256xi32>
    %35 = arith.extui %34 : vector<32x256xi1> to vector<32x256xi32>
    %36 = arith.sitofp %35 : vector<32x256xi32> to vector<32x256xf32>
    %c0_24 = arith.constant 0 : index
    %c0_25 = arith.constant 0 : index
    %37 = vector.load %arg8[%c0_24, %c0_25] : memref<8x32xf32, #tpu.memory_space<vmem>>, vector<8x32xf32>
    %cst_26 = arith.constant dense<0.000000e+00> : vector<8x256xf32>
    %38 = tpu.matmul %37, %36, %cst_26 {dimension_numbers = #tpu.dot_dimension_numbers<[1], [0], [0], [1], [0, 0, 1, 1], [], []>} : vector<8x32xf32>, vector<32x256xf32>, vector<8x256xf32> -> vector<8x256xf32>
    %c0_27 = arith.constant 0 : index
    %c0_28 = arith.constant 0 : index
    %39 = vector.load %arg10[%c0_27, %c0_28] : memref<8x8xf32, #tpu.memory_space<vmem>>, vector<8x8xf32>
    %cst_29 = arith.constant dense<0.000000e+00> : vector<8x256xf32>
    %40 = tpu.matmul %39, %38, %cst_29 {dimension_numbers = #tpu.dot_dimension_numbers<[1], [0], [0], [1], [0, 0, 1, 1], [], []>} : vector<8x8xf32>, vector<8x256xf32>, vector<8x256xf32> -> vector<8x256xf32>
    %c0_30 = arith.constant 0 : index
    %c0_31 = arith.constant 0 : index
    %41 = vector.load %arg11[%c0_30, %c0_31] : memref<8x1xf32, #tpu.memory_space<vmem>>, vector<8x1xf32>
    %42 = vector.broadcast %41 : vector<8x1xf32> to vector<8x256xf32>
    %43 = arith.addf %40, %42 : vector<8x256xf32>
    %cst_32 = arith.constant 0.000000e+00 : f32
    %44 = vector.broadcast %cst_32 : f32 to vector<8x256xf32>
    %45 = arith.maximumf %43, %44 : vector<8x256xf32>
    %c0_33 = arith.constant 0 : index
    %c0_34 = arith.constant 0 : index
    %46 = vector.load %arg12[%c0_33, %c0_34] : memref<3x8xf32, #tpu.memory_space<vmem>>, vector<3x8xf32>
    %cst_35 = arith.constant dense<0.000000e+00> : vector<3x256xf32>
    %47 = tpu.matmul %46, %45, %cst_35 {dimension_numbers = #tpu.dot_dimension_numbers<[1], [0], [0], [1], [0, 0, 1, 1], [], []>} : vector<3x8xf32>, vector<8x256xf32>, vector<3x256xf32> -> vector<3x256xf32>
    %c0_36 = arith.constant 0 : index
    %c0_37 = arith.constant 0 : index
    %48 = vector.load %arg13[%c0_36, %c0_37] : memref<3x1xf32, #tpu.memory_space<vmem>>, vector<3x1xf32>
    %49 = vector.broadcast %48 : vector<3x1xf32> to vector<3x256xf32>
    %50 = arith.addf %47, %49 : vector<3x256xf32>
    %c0_38 = arith.constant 0 : index
    %c0_39 = arith.constant 0 : index
    %c0_40 = arith.constant 0 : index
    %51 = vector.load %arg14[%c0_38, %c0_39, %c0_40] : memref<1x3x256xf32, #tpu.memory_space<vmem>>, vector<1x3x256xf32>
    %52 = vector.shape_cast %51 : vector<1x3x256xf32> to vector<3x256xf32>
    %53 = vector.shape_cast %50 : vector<3x256xf32> to vector<1x3x256xf32>
    tpu.vector_store %arg14[%c0_38, %c0_39, %c0_40], %53 {strides = array<i32>} : memref<1x3x256xf32, #tpu.memory_space<vmem>>, vector<1x3x256xf32>,
    %c256_i32 = arith.constant 256 : i32
    %54 = arith.muli %arg1, %c256_i32 : i32
    %55 = tpu.iota {dimensions = array<i32: 1>} : vector<1x256xi32>
    %56 = vector.broadcast %54 : i32 to vector<1x256xi32>
    %57 = arith.addi %56, %55 : vector<1x256xi32>
    %c256_i32_41 = arith.constant 256 : i32
    %58 = vector.broadcast %c256_i32_41 : i32 to vector<1x256xi32>
    %59 = arith.cmpi slt, %57, %58 : vector<1x256xi32>
    %60 = arith.extui %59 : vector<1x256xi1> to vector<1x256xi32>
    %61 = arith.sitofp %60 : vector<1x256xi32> to vector<1x256xf32>
    %62 = arith.subf %38, %13 : vector<8x256xf32>
    %63 = arith.mulf %62, %62 : vector<8x256xf32>
    %cst_42 = arith.constant dense<0.000000e+00> : vector<256xf32>
    %64 = vector.multi_reduction <add>, %63, %cst_42 [0] : vector<8x256xf32> to vector<256xf32>
    %65 = vector.shape_cast %64 : vector<256xf32> to vector<1x256xf32>
    %66 = arith.mulf %65, %61 : vector<1x256xf32>
    %c0_43 = arith.constant 0 : index
    %c0_44 = arith.constant 0 : index
    %c0_45 = arith.constant 0 : index
    %c0_46 = arith.constant 0 : index
    %67 = vector.load %arg16[%c0_43, %c0_44, %c0_45, %c0_46] : memref<1x1x1x256xf32, #tpu.memory_space<vmem>>, vector<1x1x1x256xf32>
    %68 = vector.shape_cast %67 : vector<1x1x1x256xf32> to vector<1x256xf32>
    %69 = vector.shape_cast %66 : vector<1x256xf32> to vector<1x1x1x256xf32>
    tpu.vector_store %arg16[%c0_43, %c0_44, %c0_45, %c0_46], %69 {strides = array<i32>} : memref<1x1x1x256xf32, #tpu.memory_space<vmem>>, vector<1x1x1x256xf32>,
    %70 = arith.subf %1, %50 : vector<3x256xf32>
    %71 = math.absf %70 : vector<3x256xf32>
    %cst_47 = arith.constant dense<0.000000e+00> : vector<256xf32>
    %72 = vector.multi_reduction <add>, %71, %cst_47 [0] : vector<3x256xf32> to vector<256xf32>
    %73 = vector.shape_cast %72 : vector<256xf32> to vector<1x256xf32>
    %74 = arith.mulf %73, %61 : vector<1x256xf32>
    %c0_48 = arith.constant 0 : index
    %c0_49 = arith.constant 0 : index
    %c0_50 = arith.constant 0 : index
    %c0_51 = arith.constant 0 : index
    %75 = vector.load %arg17[%c0_48, %c0_49, %c0_50, %c0_51] : memref<1x1x1x256xf32, #tpu.memory_space<vmem>>, vector<1x1x1x256xf32>
    %76 = vector.shape_cast %75 : vector<1x1x1x256xf32> to vector<1x256xf32>
    %77 = vector.shape_cast %74 : vector<1x256xf32> to vector<1x1x1x256xf32>
    tpu.vector_store %arg17[%c0_48, %c0_49, %c0_50, %c0_51], %77 {strides = array<i32>} : memref<1x1x1x256xf32, #tpu.memory_space<vmem>>, vector<1x1x1x256xf32>,
    return
  }
  func.func @transform_0(%arg0: i32, %arg1: i32) -> (i32, i32, i32) {
    %c0_i32 = arith.constant 0 : i32
    %c0_i32_0 = arith.constant 0 : i32
    return %arg0, %c0_i32, %arg1 : i32, i32, i32
  }
  func.func @transform_1(%arg0: i32, %arg1: i32) -> (i32, i32) {
    %c0_i32 = arith.constant 0 : i32
    %c0_i32_0 = arith.constant 0 : i32
    %c0_i32_1 = arith.constant 0 : i32
    return %c0_i32, %c0_i32_0 : i32, i32
  }
  func.func @transform_2(%arg0: i32, %arg1: i32) -> (i32, i32) {
    %c0_i32 = arith.constant 0 : i32
    %c0_i32_0 = arith.constant 0 : i32
    %c0_i32_1 = arith.constant 0 : i32
    return %c0_i32, %c0_i32_0 : i32, i32
  }
  func.func @transform_3(%arg0: i32, %arg1: i32) -> (i32, i32) {
    %c0_i32 = arith.constant 0 : i32
    %c0_i32_0 = arith.constant 0 : i32
    %c0_i32_1 = arith.constant 0 : i32
    return %c0_i32, %c0_i32_0 : i32, i32
  }
  func.func @transform_4(%arg0: i32, %arg1: i32) -> (i32, i32) {
    %c0_i32 = arith.constant 0 : i32
    %c0_i32_0 = arith.constant 0 : i32
    %c0_i32_1 = arith.constant 0 : i32
    return %c0_i32, %c0_i32_0 : i32, i32
  }
  func.func @transform_5(%arg0: i32, %arg1: i32) -> (i32, i32) {
    %c0_i32 = arith.constant 0 : i32
    %c0_i32_0 = arith.constant 0 : i32
    %c0_i32_1 = arith.constant 0 : i32
    return %c0_i32, %c0_i32_0 : i32, i32
  }
  func.func @transform_6(%arg0: i32, %arg1: i32) -> (i32, i32) {
    %c0_i32 = arith.constant 0 : i32
    %c0_i32_0 = arith.constant 0 : i32
    %c0_i32_1 = arith.constant 0 : i32
    return %c0_i32, %c0_i32_0 : i32, i32
  }
  func.func @transform_7(%arg0: i32, %arg1: i32) -> (i32, i32) {
    %c0_i32 = arith.constant 0 : i32
    %c0_i32_0 = arith.constant 0 : i32
    %c0_i32_1 = arith.constant 0 : i32
    return %c0_i32, %c0_i32_0 : i32, i32
  }
  func.func @transform_8(%arg0: i32, %arg1: i32) -> (i32, i32) {
    %c0_i32 = arith.constant 0 : i32
    %c0_i32_0 = arith.constant 0 : i32
    %c0_i32_1 = arith.constant 0 : i32
    return %c0_i32, %c0_i32_0 : i32, i32
  }
  func.func @transform_9(%arg0: i32, %arg1: i32) -> (i32, i32) {
    %c0_i32 = arith.constant 0 : i32
    %c0_i32_0 = arith.constant 0 : i32
    %c0_i32_1 = arith.constant 0 : i32
    return %c0_i32, %c0_i32_0 : i32, i32
  }
  func.func @transform_10(%arg0: i32, %arg1: i32) -> (i32, i32) {
    %c0_i32 = arith.constant 0 : i32
    %c0_i32_0 = arith.constant 0 : i32
    %c0_i32_1 = arith.constant 0 : i32
    return %c0_i32, %c0_i32_0 : i32, i32
  }
  func.func @transform_11(%arg0: i32, %arg1: i32) -> (i32, i32) {
    %c0_i32 = arith.constant 0 : i32
    %c0_i32_0 = arith.constant 0 : i32
    %c0_i32_1 = arith.constant 0 : i32
    return %c0_i32, %c0_i32_0 : i32, i32
  }
  func.func @transform_12(%arg0: i32, %arg1: i32) -> (i32, i32, i32) {
    %c0_i32 = arith.constant 0 : i32
    %c0_i32_0 = arith.constant 0 : i32
    return %arg0, %c0_i32, %arg1 : i32, i32, i32
  }
  func.func @transform_13(%arg0: i32, %arg1: i32) -> (i32, i32, i32, i32) {
    %c0_i32 = arith.constant 0 : i32
    %c0_i32_0 = arith.constant 0 : i32
    %c0_i32_1 = arith.constant 0 : i32
    return %arg0, %arg1, %c0_i32, %c0_i32_0 : i32, i32, i32, i32
  }
  func.func @transform_14(%arg0: i32, %arg1: i32) -> (i32, i32, i32, i32) {
    %c0_i32 = arith.constant 0 : i32
    %c0_i32_0 = arith.constant 0 : i32
    %c0_i32_1 = arith.constant 0 : i32
    return %arg0, %arg1, %c0_i32, %c0_i32_0 : i32, i32, i32, i32
  }
  func.func @transform_15(%arg0: i32, %arg1: i32) -> (i32, i32, i32, i32) {
    %c0_i32 = arith.constant 0 : i32
    %c0_i32_0 = arith.constant 0 : i32
    %c0_i32_1 = arith.constant 0 : i32
    return %arg0, %arg1, %c0_i32, %c0_i32_0 : i32, i32, i32, i32
  }
}

</mosaic_0001>

<bundles_post_ra>
// kernel: vq_model_cond_forward.1
= control target key start
LH: loop header
LB: loop body
LE: loop exit
PB: predicated region body
PF: predicated region fallthrough
CT: control target
= control target key end

     0   :  { %s1792_s18 = smov 0   ;;  %s1794_s19 = smov 0   ;;  %s1980_s0 = inlined_call_operand.vmem [shape: f32[2,3,256], index: 0, kind: input, shape index: {}]   ;;  %s1981_s1 = inlined_call_operand.vmem [shape: f32[16,3], index: 1, kind: input, shape index: {}]   ;;  %s1982_s2 = inlined_call_operand.vmem [shape: f32[16,1], index: 2, kind: input, shape index: {}]   ;;  %s1983_s3 = inlined_call_operand.vmem [shape: f32[8,16], index: 3, kind: input, shape index: {}]   ;;  %s1984_s4 = inlined_call_operand.vmem [shape: f32[8,1], index: 4, kind: input, shape index: {}]   ;;  %s1985_s5 = inlined_call_operand.vmem [shape: f32[32,8], index: 5, kind: input, shape index: {}]   ;;  %s1986_s6 = inlined_call_operand.vmem [shape: f32[8,32], index: 6, kind: input, shape index: {}]   ;;  %s1987_s7 = inlined_call_operand.vmem [shape: f32[32,1], index: 7, kind: input, shape index: {}]   ;;  %s1988_s8 = inlined_call_operand.vmem [shape: f32[8,8], index: 8, kind: input, shape index: {}]   ;;  %s1989_s9 = inlined_call_operand.vmem [shape: f32[8,1], index: 9, kind: input, shape index: {}]   ;;  %s1990_s10 = inlined_call_operand.vmem [shape: f32[3,8], index: 10, kind: input, shape index: {}]   ;;  %s1991_s11 = inlined_call_operand.vmem [shape: f32[3,1], index: 11, kind: input, shape index: {}]   ;;  %s1992_s12 = inlined_call_operand.vmem [shape: f32[2,3,256], index: 12, kind: output, shape index: {0}]   ;;  %s1993_s13 = inlined_call_operand.vmem [shape: s32[2,1,1,256], index: 13, kind: output, shape index: {1}]   ;;  %s1994_s14 = inlined_call_operand.vmem [shape: f32[2,1,1,256], index: 14, kind: output, shape index: {2}]   ;;  %s1995_s15 = inlined_call_operand.vmem [shape: f32[2,1,1,256], index: 15, kind: output, shape index: {3}]  }
   0x1   :  { %s1796_s20 = smov 0  }
   0x2 LB: > { %s38_s21 = sadd.s32 1, %s1702_s19  ;;  %p1613_p0 = scmp.ge.s32.totalorder %s1706_s20, 1  ;;  %s1706_s20 = sphi %s1796_s20, %s26_s20   ;;  %s1702_s19 = sphi %s1794_s19, %s1999_s19   ;;  %s1698_s18 = sphi %s1792_s18, %s1998_s18  }
   0x3   : > { %p40_p1 = scmp.ge.s32.totalorder %s38_s21, 2  ;;  %p471_p2 = scmp.lt.s32.totalorder %s1706_s20, 3 }
   0x5   : > { %s2001_s21 = smov (%p40_p1, %s38_s21), 0  ;;  %p472_p3 = pnand %p1613_p0, %p471_p2 }
   0x6   : > { %p552_p4 = scmp.lt.s32.totalorder (!%p472_p3), %s1698_s18, 1 }
   0x7   : > { %475 = sbr.rel (%p472_p3) target bundleno = 1306 (0x51a), region = 68 }
   0xc   : > { %v1708_v0 = vmov 0.0   ;;  %v599_v1 = vld [vmem:[%s1982_s2 + $0x8] sm:$0xff]  ;;  %s2003_s18 = smov (!%p552_p4, %s1698_s18), 1  ;;  %v1709_v2 = vmov 0   ;;  %v598_v3 = vld [vmem:[%s1982_s2] sm:$0xff]  ;;  %vm619_vm0 = vcmask 1042432  }
   0xd   : > { %688 = vmatprep.mubr.f32.mxu0 %v1708_v0  ;;  %780 = vmatprep.mubr.f32.mxu1 %v1708_v0  ;;  %s1651_s24 = sshll.u32 %s2003_s18, 3  ;;  %v596_v6 = vld [vmem:[%s1981_s1] sm:$0xff]  ;;  %vm612_vm1 = vcmask 23552   ;;  %v788_v7 = vld [vmem:[%s1987_s7 + $0x8] sm:$0xff]  ;;  %v790_v9 = vld [vmem:[%s1987_s7 + $0x18] sm:$0xff]  ;;  %vm712_vm2 = vcmask 130048  }
   0xe   : > { %1681 = vset.pattern.permute.xlu0 %v1709_v2  ;;  %1682 = vset.pattern.permute.xlu1 %v1709_v2  ;;  %s559_s29 = scalar_lea.vmem %s1980_s0, %s1651_s24  ;;  %v597_v8 = vld [vmem:[%s1981_s1 + $0x8] sm:$0xff]  ;;  %v1206_v10 = vld [vmem:[%s1991_s11] sm:$0x7]  ;;  %v789_v13 = vld [vmem:[%s1987_s7 + $0x10] sm:$0xff]  ;;  %vm795_vm3 = vcmask 64512   ;;  %s1911_s28 = sshll.u32 %s2003_s18, 1 }
   0xf   : > { %607 = vperm.xlu0 %1681, %v599_v1   ;;  %v1826_v4 = vld [vmem:[%s559_s29] sm:$0x77]  ;;  %v792_v36 = vld [vmem:[%s1985_s5 + $0x8] sm:$0xff]  ;;  %v793_v37 = vld [vmem:[%s1985_s5 + $0x10] sm:$0xff]  ;;  %s578_s16 = scalar_lea.vmem %s1993_s13, %s1911_s28  ;;  %s586_s29 = scalar_lea.vmem %s1994_s14, %s1911_s28 }
  0x10   : > { %v611_v5 = vcombine.high %v1826_v4, %v1826_v4  ;;  %v706_v11 = vld [vmem:[%s1984_s4] sm:$0xff]  ;;  %v794_v38 = vld [vmem:[%s1985_s5 + $0x18] sm:$0xff]  ;;  %s569_s23 = scalar_lea.vmem %s1992_s12, %s1651_s24  ;;  %s594_s25 = scalar_lea.vmem %s1995_s15, %s1911_s28 }
  0x11   : > { %709 = vperm.xlu1 %1682, %v706_v11   ;;  %v787_v12 = vld [vmem:[%s1987_s7] sm:$0xff] }
  0x12   : > { %1621 = vmatprep.subr.msk.mxu0 %vm619_vm0, %v611_v5  ;;  %v1123_v14 = vld [vmem:[%s1989_s9] sm:$0xff] }
  0x13   : > { %602 = vperm.xlu0 %1681, %v598_v3   ;;  %1622 = vmatpush1.msk.msra.mxu0 %vm619_vm0, %v1826_v4  ;;  %v705_v29 = vld [vmem:[%s1983_s3] sm:$0xff] }
  0x14   : > { %1623 = vmatmul.mubr.msk.f32.vlgmr.msra.gmra.mxu0 %vm612_vm1, %v596_v6  ;;  %v791_v35 = vld [vmem:[%s1985_s5] sm:$0xff] }
  0x15   : > { %694 = vmatprep.mubr.f32.mxu0 %v1708_v0  ;;  %907 = vperm.xlu1 %1682, %v787_v12   ;;  %v951_v12 = vlaneseq }
  0x17   : > { %912 = vperm.xlu0 %1681, %v788_v7  }
  0x18   : > { %1624 = vmatmul.mubr.msk.f32.gmra.mxu0 %vm612_vm1, %v597_v8 }
  0x19   : > { %1115 = vmatprep.mubr.f32.mxu0 %v1708_v0  ;;  %917 = vperm.xlu1 %1682, %v789_v13  }
  0x1b   : > { %922 = vperm.xlu0 %1681, %v790_v9  }
  0x1d   : > { %1126 = vperm.xlu1 %1682, %v1123_v14  }
  0x1f   : > { %1209 = vperm.xlu0 %1681, %v1206_v10  }
  0x8a   : > { %v608_v15 = vpop.permute.xlu0 %607 }
  0x8c   : > { %v710_v31 = vpop.permute.xlu1 %709 }
  0x8e   : > { %v603_v19 = vpop.permute.xlu0 %602 }
  0x90   : > { %v908_v42 = vpop.permute.xlu1 %907 }
  0x92   : > { %v913_v44 = vpop.permute.xlu0 %912 }
  0x94   : > { %v918_v51 = vpop.permute.xlu1 %917 }
  0x96   : > { %v923_v57 = vpop.permute.xlu0 %922 }
  0xd4   : > { %v690_v16 = vpop.f32.mrf.mxu0 }
  0xd5   : > { %v691_v24 = vadd.f32 %v690_v16, %v603_v19 }
  0xd6   : > { %v692_v17 = vpop.f32.mrf.mxu0 }
  0xd7   : > { %v693_v22 = vadd.f32 %v692_v17, %v603_v19  ;;  %v701_v28 = vmax.f32 %v691_v24, 0.0  ;;  %v1892_v17 = vshrl.u32 %v951_v12, 7 }
  0xd8   : > { %v696_v18 = vpop.f32.mrf.mxu0 }
  0xd9   : > { %v697_v20 = vadd.f32 %v696_v18, %v608_v15  ;;  %v702_v27 = vmax.f32 %v693_v22, 0.0  ;;  %v1895_v22 = vadd.s32 8, %v1892_v17  ;;  %v955_v24 = vadd.s32 24, %v1892_v17 }
  0xda   : > { %v698_v21 = vpop.f32.mrf.mxu0 }
  0xdb   : > { %v699_v23 = vadd.f32 %v698_v21, %v608_v15  ;;  %v703_v26 = vmax.f32 %v697_v20, 0.0 }
  0xdd   : > { %v704_v25 = vmax.f32 %v699_v23, 0.0  ;;  %v1898_v23 = vadd.s32 16, %v1892_v17 }
  0xdf   : > { %744 = vmatprep.subr.mxu1 %v704_v25 }
  0xe0   : > { %745 = vmatpush1.msra.mxu1 %v703_v26 }
  0xe1   : > { %746 = vmatprep.subr.mxu1 %v702_v27 }
  0xe2   : > { %747 = vmatpush1.msra.mxu1 %v701_v28 }
  0xe3   : > { %1625 = vmatmul.mubr.msk.f32.vlgmr.msra.gmra.mxu1 %vm712_vm2, %v705_v29 }
  0xe4   : > { %872 = vmatprep.mubr.f32.mxu1 %v1708_v0 }
 0x1a3   : > { %v782_v30 = vpop.f32.mrf.mxu1 }
 0x1a4   : > { %v1868_v34 = vadd.f32 %v782_v30, %v710_v31 }
 0x1a5   : > { %v784_v32 = vpop.f32.mrf.mxu1 }
 0x1a6   : > { %v1866_v33 = vadd.f32 %v784_v32, %v710_v31 }
 0x1a8   : > { %838 = vmatprep.subr.mxu1 %v1866_v33 }
 0x1a9   : > { %839 = vmatpush1.msra.mxu1 %v1868_v34 }
 0x1aa   : > { %1626 = vmatmul.mubr.msk.f32.vlgmr.msra.gmra.mxu1 %vm795_vm3, %v791_v35 }
 0x1ab   : > { %878 = vmatprep.mubr.f32.mxu1 %v1708_v0 }
 0x1ae   : > { %1627 = vmatmul.mubr.msk.f32.gmra.mxu1 %vm795_vm3, %v792_v36 }
 0x1af   : > { %884 = vmatprep.mubr.f32.mxu1 %v1708_v0 }
 0x1b2   : > { %1628 = vmatmul.mubr.msk.f32.gmra.mxu1 %vm795_vm3, %v793_v37 }
 0x1b3   : > { %890 = vmatprep.mubr.f32.mxu1 %v1708_v0 }
 0x1b6   : > { %1629 = vmatmul.mubr.msk.f32.gmra.mxu1 %vm795_vm3, %v794_v38 }
 0x26a   : > { %v874_v39 = vpop.f32.mrf.mxu1 }
 0x26b   : > { %v897_v47 = vmul.f32 2.0, %v874_v39 }
 0x26c   : > { %v876_v40 = vpop.f32.mrf.mxu1 }
 0x26d   : > { %v898_v52 = vmul.f32 2.0, %v876_v40  ;;  %v925_v58 = vsub.f32 %v908_v42, %v897_v47 }
 0x26e   : > { %v880_v41 = vpop.f32.mrf.mxu1 }
 0x26f   : > { %v899_v49 = vmul.f32 2.0, %v880_v41  ;;  %v926_v1 = vsub.f32 %v908_v42, %v898_v52 }
 0x270   : > { %v882_v43 = vpop.f32.mrf.mxu1 }
 0x271   : > { %v900_v54 = vmul.f32 2.0, %v882_v43  ;;  %v927_v60 = vsub.f32 %v913_v44, %v899_v49  ;;  %v1710_v49 = vmov 1966171168  }
 0x272   : > { %v886_v45 = vpop.f32.mrf.mxu1 }
 0x273   : > { %v901_v46 = vmul.f32 2.0, %v886_v45  ;;  %v928_v2 = vsub.f32 %v913_v44, %v900_v54 }
 0x274   : > { %v888_v48 = vpop.f32.mrf.mxu1 }
 0x275   : > { %v902_v50 = vmul.f32 2.0, %v888_v48  ;;  %v929_v55 = vsub.f32 %v918_v51, %v901_v46 }
 0x276   : > { %v892_v53 = vpop.f32.mrf.mxu1 }
 0x277   : > { %v903_v56 = vmul.f32 2.0, %v892_v53  ;;  %v930_v61 = vsub.f32 %v918_v51, %v902_v50  ;;  %v933_v3 = vmin.f32 %v925_v58, %v929_v55  ;;  %v1004_v50 = vunpack.c.l.s4 %v1710_v49 }
 0x278   : > { %v894_v59 = vpop.f32.mrf.mxu1 }
 0x279   : > { %v931_v62 = vsub.f32 %v923_v57, %v903_v56  ;;  %v904_v63 = vmul.f32 2.0, %v894_v59  ;;  %v942_v7 = vmin.f32 %v926_v1, %v930_v61  ;;  %v1005_v54 = vunpack.c.0.s8 %v1004_v50 }
 0x27b   : > { %v934_v5 = vmin.f32 %v927_v60, %v931_v62  ;;  %v932_v6 = vsub.f32 %v923_v57, %v904_v63 }
 0x27d   : > { %v935_v8 = vmin.f32 %v933_v3, %v934_v5  ;;  %v943_v9 = vmin.f32 %v928_v2, %v932_v6 }
 0x27f   : > { %v936_v10 = vrot.slane %v935_v8, 4  ;;  %v944_v11 = vmin.f32 %v942_v7, %v943_v9  ;;  %v1122_v7 = vld [vmem:[%s1988_s8] sm:$0xff] }
 0x281   : > { %v937_v13 = vmin.f32 %v935_v8, %v936_v10  ;;  %v945_v14 = vrot.slane %v944_v11, 4 }
 0x283   : > { %v938_v15 = vrot.slane %v937_v13, 2  ;;  %v946_v16 = vmin.f32 %v944_v11, %v945_v14 }
 0x285   : > { %v939_v18 = vmin.f32 %v937_v13, %v938_v15  ;;  %v947_v19 = vrot.slane %v946_v16, 2 }
 0x287   : > { %v940_v20 = vrot.slane %v939_v18, 1  ;;  %v948_v21 = vmin.f32 %v946_v16, %v947_v19 }
 0x289   : > { %v941_v25 = vmin.f32 %v939_v18, %v940_v20  ;;  %v949_v26 = vrot.slane %v948_v21, 1 }
 0x28b   : > { %vm956_vm4 = vcmp.eq.f32.partialorder %v925_v58, %v941_v25  ;;  %vm958_vm5 = vcmp.eq.f32.partialorder %v927_v60, %v941_v25  ;;  %vm960_vm6 = vcmp.eq.f32.partialorder %v929_v55, %v941_v25  ;;  %vm962_vm7 = vcmp.eq.f32.partialorder %v931_v62, %v941_v25 }
 0x28c   : > { %v964_v27 = vsel %vm956_vm4, %v1892_v17, 32  ;;  %v966_v28 = vsel %vm958_vm5, %v1895_v22, 32  ;;  %v968_v29 = vsel %vm960_vm6, %v1898_v23, 32  ;;  %v970_v30 = vsel %vm962_vm7, %v955_v24, 32 }
 0x28d   : > { %vm972_vm8 = vcmp.lt.s32.totalorder %v964_v27, %v968_v29  ;;  %vm974_vm9 = vcmp.lt.s32.totalorder %v966_v28, %v970_v30  ;;  %v950_v31 = vmin.f32 %v948_v21, %v949_v26  ;;  %v1908_v58 = vsub.s32 %v1005_v54, %v1892_v17 }
 0x28e   : > { %v973_v32 = vsel %vm972_vm8, %v964_v27, %v968_v29  ;;  %v975_v35 = vsel %vm974_vm9, %v966_v28, %v970_v30  ;;  %v1205_v30 = vld [vmem:[%s1990_s10] sm:$0x7] }
 0x28f   : > { %vm976_vm10 = vcmp.lt.s32.totalorder %v973_v32, %v975_v35  ;;  %vm957_vm11 = vcmp.eq.f32.partialorder %v926_v1, %v950_v31  ;;  %vm959_vm12 = vcmp.eq.f32.partialorder %v928_v2, %v950_v31  ;;  %vm961_vm13 = vcmp.eq.f32.partialorder %v930_v61, %v950_v31  ;;  %v1046_v2 = vld [vmem:[%s1986_s6] sm:$0xff] }
 0x290   : > { %v977_v36 = vsel %vm976_vm10, %v973_v32, %v975_v35  ;;  %vm963_vm14 = vcmp.eq.f32.partialorder %v932_v6, %v950_v31  ;;  %v965_v37 = vsel %vm957_vm11, %v1892_v17, 32  ;;  %v967_v38 = vsel %vm959_vm12, %v1895_v22, 32  ;;  %v1210_v32 = vpop.permute.xlu0 %1209 }
 0x291   : > { %v978_v39 = vrot.slane %v977_v36, 4  ;;  %v969_v40 = vsel %vm961_vm13, %v1898_v23, 32  ;;  %v971_v41 = vsel %vm963_vm14, %v955_v24, 32  ;;  %v1711_v61 = vmov 1.0  }
 0x292   : > { %vm987_vm15 = vcmp.lt.s32.totalorder %v965_v37, %v969_v40  ;;  %vm989_vm1 = vcmp.lt.s32.totalorder %v967_v38, %v971_v41  ;;  %vm1921_vm14 = vcmp.lt.s32.totalorder %v951_v12, 256 }
 0x293   : > { %vm979_vm2 = vcmp.lt.s32.totalorder %v977_v36, %v978_v39  ;;  %v988_v42 = vsel %vm987_vm15, %v965_v37, %v969_v40  ;;  %v990_v43 = vsel %vm989_vm1, %v967_v38, %v971_v41 }
 0x294   : > { %v980_v44 = vsel %vm979_vm2, %v977_v36, %v978_v39  ;;  %vm991_vm4 = vcmp.lt.s32.totalorder %v988_v42, %v990_v43 }
 0x295   : > { %v981_v45 = vrot.slane %v980_v44, 2  ;;  %v992_v46 = vsel %vm991_vm4, %v988_v42, %v990_v43  ;;  %vm1047_vm4 = vcmask 261120  }
 0x296   : > { %v993_v47 = vrot.slane %v992_v46, 4 }
 0x297   : > { %vm982_vm5 = vcmp.lt.s32.totalorder %v980_v44, %v981_v45 }
 0x298   : > { %vm994_vm6 = vcmp.lt.s32.totalorder %v992_v46, %v993_v47  ;;  %v983_v48 = vsel %vm982_vm5, %v980_v44, %v981_v45 }
 0x299   : > { %v995_v51 = vsel %vm994_vm6, %v992_v46, %v993_v47  ;;  %v984_v52 = vrot.slane %v983_v48, 1 }
 0x29a   : > { %v996_v53 = vrot.slane %v995_v51, 2 }
 0x29b   : > { %vm985_vm8 = vcmp.lt.s32.totalorder %v983_v48, %v984_v52 }
 0x29c   : > { %vm997_vm7 = vcmp.lt.s32.totalorder %v995_v51, %v996_v53  ;;  %v986_v57 = vsel %vm985_vm8, %v983_v48, %v984_v52 }
 0x29d   : > { %v998_v55 = vsel %vm997_vm7, %v995_v51, %v996_v53  ;;  %vm1028_vm11 = vcmp.eq.s32.totalorder %v955_v24, %v986_v57  ;;  %vm1026_vm13 = vcmp.eq.s32.totalorder %v1898_v23, %v986_v57  ;;  %vm1024_vm1 = vcmp.eq.s32.totalorder %v1895_v22, %v986_v57 }
 0x29e   : > { %v999_v56 = vrot.slane %v998_v55, 1  ;;  %vm1022_vm5 = vcmp.eq.s32.totalorder %v1892_v17, %v986_v57 }
 0x2a0   : > { %vm1000_vm9 = vcmp.lt.s32.totalorder %v998_v55, %v999_v56 }
 0x2a1   : > { %v1001_v59 = vsel %vm1000_vm9, %v998_v55, %v999_v56 }
 0x2a2   : > { %vm1029_vm10 = vcmp.eq.s32.totalorder %v955_v24, %v1001_v59  ;;  %v1002_v60 = vcombine.low %v986_v57, %v1001_v59  ;;  %vm1027_vm12 = vcmp.eq.s32.totalorder %v1898_v23, %v1001_v59  ;;  %vm1025_vm15 = vcmp.eq.s32.totalorder %v1895_v22, %v1001_v59  ;;  %v1127_v24 = vpop.permute.xlu1 %1126 }
 0x2a3   : > { %1638 = vmatprep.subr.msk.mxu0 %vm1029_vm10, %v1711_v61  ;;  %vm1023_vm2 = vcmp.eq.s32.totalorder %v1892_v17, %v1001_v59 }
 0x2a4   : > { %v1009_v62 = vrot.slane %v1002_v60, %v1908_v58  ;;  %1639 = vmatpush1.msk.msra.mxu0 %vm1028_vm11, %v1711_v61 }
 0x2a5   : > { %1640 = vmatprep.subr.msk.mxu0 %vm1027_vm12, %v1711_v61 }
 0x2a6   : > { %v1016_v1 = vrot.slane %v1009_v62, %v1908_v58  ;;  %1641 = vmatpush1.msk.msra.mxu0 %vm1026_vm13, %v1711_v61 }
 0x2a7   : > { %1642 = vmatprep.subr.msk.mxu0 %vm1025_vm15, %v1711_v61 }
 0x2a8   : > { %1643 = vmatpush1.msk.msra.mxu0 %vm1024_vm1, %v1711_v61  ;;  %1021 = vst.msk [vmem:[%s578_s16] sm:$0x3] %vm1921_vm14, %v1016_v1 }
 0x2a9   : > { %1644 = vmatprep.subr.msk.mxu0 %vm1023_vm2, %v1711_v61 }
 0x2aa   : > { %1645 = vmatpush1.msk.msra.mxu0 %vm1022_vm5, %v1711_v61 }
 0x2ab   : > { %1646 = vmatmul.mubr.msk.f32.vlgmr.msra.gmra.mxu0 %vm1047_vm4, %v1046_v2 }
 0x2ac   : > { %1196 = vmatprep.mubr.f32.mxu0 %v1708_v0 }
 0x36b   : > { %v1117_v3 = vpop.f32.mrf.mxu0 }
 0x36c   : > { %v1304_v5 = vsub.f32 %v1117_v3, %v1868_v34 }
 0x36d   : > { %v1119_v6 = vpop.f32.mrf.mxu0 }
 0x36e   : > { %v1306_v8 = vmul.f32 %v1304_v5, %v1304_v5  ;;  %v1305_v9 = vsub.f32 %v1119_v6, %v1866_v33  ;;  %1162 = vmatprep.subr.mxu0 %v1119_v6 }
 0x36f   : > { %1163 = vmatpush1.msra.mxu0 %v1117_v3 }
 0x370   : > { %v1308_v10 = vrot.slane %v1306_v8, 4  ;;  %v1307_v11 = vmul.f32 %v1305_v9, %v1305_v9  ;;  %1647 = vmatmul.mubr.msk.f32.vlgmr.msra.gmra.mxu0 %vm795_vm3, %v1122_v7 }
 0x371   : > { %1279 = vmatprep.mubr.f32.mxu0 %v1708_v0 }
 0x372   : > { %v1309_v12 = vadd.f32 %v1308_v10, %v1306_v8  ;;  %v1314_v13 = vrot.slane %v1307_v11, 4 }
 0x374   : > { %v1310_v34 = vrot.slane %v1309_v12, 2  ;;  %v1315_v14 = vadd.f32 %v1314_v13, %v1307_v11 }
 0x376   : > { %v1311_v15 = vadd.f32 %v1310_v34, %v1309_v12  ;;  %v1316_v16 = vrot.slane %v1315_v14, 2 }
 0x378   : > { %v1312_v17 = vrot.slane %v1311_v15, 1  ;;  %v1317_v18 = vadd.f32 %v1316_v16, %v1315_v14 }
 0x37a   : > { %v1318_v19 = vrot.slane %v1317_v18, 1  ;;  %v1313_v20 = vadd.f32 %v1312_v17, %v1311_v15 }
 0x37c   : > { %v1319_v33 = vadd.f32 %v1318_v19, %v1317_v18 }
 0x37e   : > { %v1324_v21 = vcombine.low %v1313_v20, %v1319_v33 }
 0x380   : > { %v1331_v22 = vrot.slane %v1324_v21, %v1908_v58 }
 0x382   : > { %v1338_v0 = vrot.slane %v1331_v22, %v1908_v58 }
 0x384   : > { %1340 = vst.msk [vmem:[%s586_s29] sm:$0x3] %vm1921_vm14, %v1338_v0 }
 0x430   : > { %v1198_v23 = vpop.f32.mrf.mxu0 }
 0x431   : > { %v1199_v25 = vadd.f32 %v1198_v23, %v1127_v24 }
 0x432   : > { %v1200_v26 = vpop.f32.mrf.mxu0 }
 0x433   : > { %v1201_v27 = vadd.f32 %v1200_v26, %v1127_v24  ;;  %v1203_v29 = vmax.f32 %v1199_v25, 0.0 }
 0x435   : > { %v1204_v28 = vmax.f32 %v1201_v27, 0.0 }
 0x437   : > { %1245 = vmatprep.subr.mxu0 %v1204_v28 }
 0x438   : > { %1246 = vmatpush1.msra.mxu0 %v1203_v29 }
 0x439   : > { %1648 = vmatmul.mubr.msk.f32.vlgmr.msra.gmra.mxu0 %vm795_vm3, %v1205_v30 }
 0x4f9   : > { %v1281_v31 = vpop.f32.mrf.mxu0 }
 0x4fa   : > { %v1282_v36 = vadd.f32 %v1281_v31, %v1210_v32 }
 0x4fb   : > { %v1283_v35 = vpop.f32.mrf.mxu0 }
 0x4fc   : > { %v1284_v37 = vadd.f32 %v1283_v35, %v1210_v32 }
 0x4fe   : > { %v1288_v38 = vcombine.low %v1282_v36, %v1284_v37 }
 0x500   : > { %1290 = vst [vmem:[%s569_s23] sm:$0x77] %v1288_v38  ;;  %v1341_v39 = vsub.f32 %v1826_v4, %v1288_v38 }
 0x502   : > { %v1342_v40 = vand.u32 2147483647, %v1341_v39 }
 0x504   : > { %v1344_v41 = vcombine.high %v1342_v40, %v1342_v40  ;;  %v1346_v42 = vsel %vm619_vm0, %v1342_v40, 0.0 }
 0x505   : > { %v1347_v43 = vrot.slane %v1346_v42, 4 }
 0x506   : > { %v1353_v44 = vsel %vm619_vm0, %v1344_v41, 0.0 }
 0x507   : > { %v1348_v45 = vadd.f32 %v1347_v43, %v1346_v42  ;;  %v1354_v46 = vrot.slane %v1353_v44, 4 }
 0x509   : > { %v1349_v47 = vrot.slane %v1348_v45, 2  ;;  %v1355_v48 = vadd.f32 %v1354_v46, %v1353_v44 }
 0x50b   : > { %v1350_v49 = vadd.f32 %v1349_v47, %v1348_v45  ;;  %v1356_v50 = vrot.slane %v1355_v48, 2 }
 0x50d   : > { %v1351_v51 = vrot.slane %v1350_v49, 1  ;;  %v1357_v52 = vadd.f32 %v1356_v50, %v1355_v48 }
 0x50f   : > { %v1358_v53 = vrot.slane %v1357_v52, 1  ;;  %v1352_v54 = vadd.f32 %v1351_v51, %v1350_v49 }
 0x511   : > { %v1359_v55 = vadd.f32 %v1358_v53, %v1357_v52 }
 0x513   : > { %v1364_v4 = vcombine.low %v1352_v54, %v1359_v55 }
 0x515   : > { %v1371_v56 = vrot.slane %v1364_v4, %v1908_v58 }
 0x517   : > { %v1378_v57 = vrot.slane %v1371_v56, %v1908_v58 }
 0x519   : > { %1380 = vst.msk [vmem:[%s594_s25] sm:$0x3] %vm1921_vm14, %v1378_v57 }
 0x51a PF: > { %s26_s20 = sadd.s32 1, %s1706_s20   ;;  %s1998_s18 = smov %s1702_s19 }
 0x51b   : > { %p23_p5 = scmp.ge.s32.totalorder %s26_s20, 4   ;;  %s1999_s19 = smov %s2001_s21 }
 0x51d   :  { %25 = sbr.rel (!%p23_p5) target bundleno = 2 (0x2), region = 134 }

</bundles_post_ra>
